<compile_context>
chip_gen: v7x
topology: tpu7x:2x2x1
jax: 0.10.0
libtpu: 0.0.40
codegen_flags: <defaults>
</compile_context>

<pallas_src>
import jax
import jax.numpy as jnp
from jax.experimental import pallas as pl
from jax.experimental.pallas import tpu as pltpu


def _copy_kernel(x_ref, o_ref):
    # Lane-dense (block_rows, LANE) slab copy.
    o_ref[...] = x_ref[...]


def height_compression(
    dense_5d,
    *,
    materialize=False,
    alias_input=False,
    target_block_bytes=8 * 1024 * 1024,
    vmem_limit_bytes=48 * 1024 * 1024,
):
    """dense_5d: (N, C, D, H, W) -> spatial_features: (N, C*D, H, W).

    materialize=False (default): metadata-only reshape, zero HBM traffic.
    materialize=True: run the Pallas copy kernel into a fresh buffer.
    """
    N, C, D, H, W = dense_5d.shape
    out_shape = (N, C * D, H, W)

    # Fast path: the op is a pure contiguous reshape; nothing tuned inside a
    # copy can beat not copying.
    if not materialize:
        return dense_5d.reshape(out_shape)

    total = N * C * D * H * W
    itemsize = jnp.dtype(dense_5d.dtype).itemsize

    # Pick a lane-dense flat layout (rows, lane): lane is a large multiple of
    # 128 so every vreg/store is full-lane; prefer a lane that still leaves a
    # reasonable number of rows to tile over.
    lane = None
    for cand in (4096, 2048, 1024, 512, 256, 128):
        if total % cand == 0 and total // cand >= 16:
            lane = cand
            break
    if lane is None:
        for cand in (4096, 2048, 1024, 512, 256, 128):
            if total % cand == 0:
                lane = cand
                break
    if lane is None:
        # total not a multiple of 128 -> no lane-dense tiling; the reshape is
        # still exactly the module's semantics.
        return dense_5d.reshape(out_shape)

    rows = total // lane
    # Contiguous reshape: pure metadata (this *is* the height compression).
    flat = dense_5d.reshape(rows, lane)

    # Sublane-packing multiple for the dtype: 8 (f32), 16 (bf16/f16), 32 (i8).
    mult = max(8, 32 // itemsize)
    bytes_per_row = lane * itemsize

    block_rows = (target_block_bytes // bytes_per_row // mult) * mult
    if block_rows <= 0:
        block_rows = mult
    block_rows = min(block_rows, rows)

    if block_rows >= rows:
        # Single block -> no DMA/compute overlap to win; the launch cost plus
        # serialized DMA-in -> copy -> DMA-out is strictly slower than a
        # metadata reshape (values are identical either way).
        return dense_5d.reshape(out_shape)

    grid = (pl.cdiv(rows, block_rows),)

    kwargs = {}
    if alias_input:
        # Reuse the input HBM buffer for the output (caller should donate the
        # input at the jit boundary for this to avoid a defensive copy).
        kwargs["input_output_aliases"] = {0: 0}

    flat_out = pl.pallas_call(
        _copy_kernel,
        out_shape=jax.ShapeDtypeStruct((rows, lane), dense_5d.dtype),
        grid=grid,
        in_specs=[pl.BlockSpec((block_rows, lane), lambda i: (i, 0))],
        out_specs=pl.BlockSpec((block_rows, lane), lambda i: (i, 0)),
        compiler_params=pltpu.CompilerParams(
            # "parallel" lets the runtime shard the copy across v7x's 2 TCs;
            # if profiling ever shows one TC doing all the DMA, switch this
            # axis to pltpu.CORE_PARALLEL and keep the step count even.
            dimension_semantics=("parallel",),
            vmem_limit_bytes=vmem_limit_bytes,
        ),
        # Pure-bandwidth op: read + write of the whole tensor, zero flops.
        cost_estimate=pl.CostEstimate(
            flops=0, transcendentals=0, bytes_accessed=2 * total * itemsize
        ),
        **kwargs,
    )(flat)

    # Contiguous reshape back to the NCHW BEV layout (metadata only).
    return flat_out.reshape(out_shape)


if __name__ == "__main__":
    # Small, deterministic example consistent with the module:
    #   N=2 batches, C=4 spconv channels, D=8 height bins, H=W=16 BEV grid
    #   => NUM_BEV_FEATURES = C * D = 32
    key = jax.random.PRNGKey(0)
    N, C, D, H, W = 2, 4, 8, 16, 16
    dense = jax.random.normal(key, (N, C, D, H, W), dtype=jnp.float32)

    # Reference: exactly torch's .view(N, C*D, H, W) on a contiguous tensor.
    ref = dense.reshape(N, C * D, H, W)

    # Default path: metadata-only reshape (the recommended production path).
    fast = jax.block_until_ready(height_compression(dense))
    assert fast.shape == (N, C * D, H, W)
    assert fast.dtype == dense.dtype
    assert jnp.array_equal(fast, ref)

    # Materialized path: exercises the Pallas copy kernel.  A small
    # target_block_bytes forces a multi-step pipelined grid even at this
    # small demo size (production default is 8 MiB blocks).
    spatial_features = height_compression(
        dense, materialize=True, target_block_bytes=8 * 1024
    )
    spatial_features = jax.block_until_ready(spatial_features)

    assert spatial_features.shape == (N, C * D, H, W)
    assert spatial_features.dtype == dense.dtype
    assert jnp.array_equal(spatial_features, ref)

    # spatial_features_stride is metadata passthrough of
    # encoded_spconv_tensor_stride (no compute).
    spatial_features_stride = 8

    print("KERNEL_OK")
</pallas_src>

<mosaic_0001>
module attributes {stable_mosaic.version = 11 : i64} {
  func.func @_copy_kernel(%arg0: i32, %arg1: memref<8x1024xf32, #tpu.memory_space<vmem>>, %arg2: memref<8x1024xf32, #tpu.memory_space<vmem>>) attributes {dimension_semantics = [#tpu.dimension_semantics<parallel>], iteration_bounds = array<i64: 2>, scalar_prefetch = 0 : i64, scratch_operands = 0 : i64, tpu.core_type = #tpu.core_type<tc>, window_params = [{transform_indices = @transform_0, window_bounds = array<i64: 8, 1024>}, {transform_indices = @transform_1, window_bounds = array<i64: 8, 1024>}]} {
    %c0 = arith.constant 0 : index
    %c0_0 = arith.constant 0 : index
    %0 = vector.load %arg1[%c0, %c0_0] : memref<8x1024xf32, #tpu.memory_space<vmem>>, vector<8x1024xf32>
    %c0_1 = arith.constant 0 : index
    %c0_2 = arith.constant 0 : index
    %1 = vector.load %arg2[%c0_1, %c0_2] : memref<8x1024xf32, #tpu.memory_space<vmem>>, vector<8x1024xf32>
    tpu.vector_store %arg2[%c0_1, %c0_2], %0 {strides = array<i32>} : memref<8x1024xf32, #tpu.memory_space<vmem>>, vector<8x1024xf32>,
    return
  }
  func.func @transform_0(%arg0: i32) -> (i32, i32) {
    %c0_i32 = arith.constant 0 : i32
    %c0_i32_0 = arith.constant 0 : i32
    return %arg0, %c0_i32 : i32, i32
  }
  func.func @transform_1(%arg0: i32) -> (i32, i32) {
    %c0_i32 = arith.constant 0 : i32
    %c0_i32_0 = arith.constant 0 : i32
    return %arg0, %c0_i32 : i32, i32
  }
}

</mosaic_0001>

<bundles_post_ra>
// kernel: tpu_custom_call.1
= control target key start
LH: loop header
LB: loop body
LE: loop exit
PB: predicated region body
PF: predicated region fallthrough
CT: control target
= control target key end

     0   :  { %6 = vsyncpa [#allocation3], 0  ;;  %s567_s0 = inlined_call_operand.hbm [shape: f32[16,1024], index: 0, kind: input, shape index: {}]   ;;  %s568_s1 = inlined_call_operand.hbm [shape: f32[16,1024], index: 1, kind: output, shape index: {}]  }
   0x1   :  { %8 = vsyncpa [#allocation3 + $0x1], 0 }
   0x2   :  { %9 = vsyncpa [#allocation4], 0 }
   0x3   :  { %11 = vsyncpa [#allocation4 + $0x1], 0  ;;  %s406_s6 = smov 0   ;;  %s408_s7 = smov 0  }
   0x4   :  { %s410_s8 = smov 0   ;;  %s412_s9 = smov 0  }
   0x5 LB: > { %s427_s10 = sadd.s32 4294967295, %s392_s9   ;;  %s234_s11 = sadd.s32 4294967294, %s392_s9   ;;  %s392_s9 = sphi %s412_s9, %s583_s9   ;;  %s388_s8 = sphi %s410_s8, %s582_s8   ;;  %s384_s7 = sphi %s408_s7, %s581_s7   ;;  %s380_s6 = sphi %s406_s6, %s580_s6  }
   0x6   : > { %s431_s12 = sadd.s32 1, %s392_s9   ;;  %s24_s13 = sadd.s32 1, %s388_s8 }
   0x7   : > { %s21_s14 = ssub.s32 %s392_s9, %s431_s12  ;;  %p31_p0 = scmp.ne.s32.totalorder %s388_s8, %s384_s7 }
   0x8   : > { %p22_p1 = scmp.eq.s32.totalorder %s21_s14, 0  ;;  %p32_p2 = scmp.eq.s32.totalorder %s392_s9, 0 }
   0x9   : > { %p37_p3 = scmp.ne.s32.totalorder %s384_s7, %s380_s6  ;;  %p38_p4 = scmp.eq.s32.totalorder %s427_s10, 0 }
   0xa   : > { %s443_s15 = scalar_select %p22_p1, %s388_s8, %s24_s13  }
   0xb   : > { %p445_p5 = por %p32_p2, %p31_p0  ;;  %p449_p6 = por %p38_p4, %p37_p3 }
   0xc   : > { %p61_p7 = scmp.eq.s32.totalorder %s427_s10, 1  ;;  %p67_p8 = scmp.eq.s32.totalorder %s234_s11, 1 }
   0xd   : > { %p262_p10 = scmp.lt.s32.totalorder %s392_s9, 2  ;;  %s87_s20 = sand.u32 1, %s388_s8  }
   0xe   : > { %p456_p11 = por %p61_p7, %p31_p0  ;;  %p460_p12 = por %p67_p8, %p37_p3 }
   0xf   : > { %s248_s21 = sshll.u32 %s392_s9, 10  ;;  %s237_s22 = sshll.u32 %s87_s20, 6 }
  0x10   : > { %s572_s18 = scalar_select %p456_p11, 1, 0 }
  0x11   : > { %s573_s19 = scalar_select %p460_p12, 1, 0 }
  0x12   : > { %s469_s25 = scalar_lea.hbm %s567_s0, %s248_s21  ;;  %s91_s26 = scalar_lea.vmem [#allocation2], %s237_s22 }
  0x13   : > { %s99_s27 = sshll.u32 %s91_s26, 4  ;;  %p473_p13 = pnand %p262_p10, %p445_p5  ;;  %s477_s27 = int_to_ptr.vmem [resolvable:$true] %s99_s27 }
  0x14   : > { %s88_s29 = scalar_lea.sflag [#allocation3], %s87_s20  ;;  %s296_s30 = scalar_lea.hbm %s469_s25, 1024 }
  0x15   : > { %p297_p2 = scmp.ne.s32.totalorder %s469_s25, %s296_s30  ;;  %p298_p3 = pneg %p473_p13 }
  0x16   : > { %s301_s4 = scalar_lea.hbm %s567_s0, 2048  ;;  %p302_p5 = scmp.lt.u32.totalorder %s469_s25, %s567_s0 }
  0x17   : > { %p299_p4 = pnand %p298_p3, %p297_p2  ;;  %p303_p8 = scmp.lt.u32.totalorder %s301_s4, %s296_s30 }
  0x18   : > { %p305_p9 = scmp.lt.u32.totalorder %s296_s30, %s469_s25 }
  0x19   : > { %p300_p7 = pneg %p299_p4  ;;  %p304_p10 = por %p303_p8, %p302_p5 }
  0x1b   : > { %p306_p0 = por %p305_p9, %p304_p10 }
  0x1d   : > { %p307_p1 = pnand %p306_p0, %p300_p7 }
  0x1f   : > { %310 = shalt.err (!%p307_p1)
}
  0x20   : > { %s311_s13 = scalar_lea.vmem %s477_s27, 1024  ;;  %s394_s14 = smov [#allocation2]  }
  0x21   : > { %p312_p2 = scmp.ne.s32.totalorder %s477_s27, %s311_s13  ;;  %s316_s16 = sshll.u32 %s394_s14, 4  ;;  %s317_s16 = int_to_ptr.vmem [resolvable:$false] %s316_s16 }
  0x22   : > { %s318_s20 = scalar_lea.vmem %s317_s16, 2048  ;;  %p319_p11 = scmp.lt.s32.totalorder %s477_s27, %s317_s16 }
  0x23   : > { %p314_p4 = pnand %p312_p2, %p298_p3  ;;  %p320_p5 = scmp.lt.s32.totalorder %s318_s20, %s311_s13 }
  0x25   : > { %p315_p12 = pneg %p314_p4  ;;  %p321_p8 = por %p320_p5, %p319_p11 }
  0x27   : > { %p322_p9 = pnand %p321_p8, %p315_p12 }
  0x29   : > { %325 = shalt.err (!%p322_p9)
}
  0x2a   : > { %257 = dma.hbm_to_vmem [thread:$0]  (!%p473_p13), %s469_s25, 1024, %s477_s27, %s88_s29  }
  0x2b   : > { %p575_p0 = scmp.lt.s32.totalorder %s392_s9, 3  ;;  %p576_p1 = scmp.ge.s32.totalorder %s392_s9, 1 }
  0x2d   : > { %p105_p3 = pnand %p576_p1, %p575_p0 }
  0x2e   : > { %s511_s21 = sand.u32 (!%p105_p3), 1, %s384_s7  }
  0x2f   : > { %108 = sbr.rel (%p105_p3) target bundleno = 81 (0x51), region = 24  ;;  %s241_s22 = sshll.u32 (!%p105_p3), %s511_s21, 6 }
  0x30   : > { %s111_s23 = scalar_lea.sflag (!%p105_p3), [#allocation3], %s511_s21  ;;  %s114_s24 = scalar_lea.vmem (!%p105_p3), [#allocation2], %s241_s22 }
  0x36   : > { %371 = dma.done.wait (%p449_p6), %s111_s23, 1024  }
  0x37   : > { %373 = vsyncadd (%p449_p6), %s111_s23, 4294966272  ;;  %s249_s25 = sshll.u32 %s427_s10, 10  ;;  %s132_s26 = scalar_lea.vmem [#allocation5], %s241_s22  ;;  %v133_v0 = vld [vmem:[%s114_s24] sm:$0xff]  ;;  %v134_v1 = vld [vmem:[%s114_s24 + $0x8] sm:$0xff] }
  0x38   : > { %s164_s27 = sshll.u32 %s132_s26, 4  ;;  %v135_v2 = vld [vmem:[%s114_s24 + $0x10] sm:$0xff]  ;;  %141 = vst [vmem:[%s132_s26] sm:$0xff] %v133_v0  ;;  %142 = vst [vmem:[%s132_s26 + $0x8] sm:$0xff] %v134_v1  ;;  %v136_v3 = vld [vmem:[%s114_s24 + $0x18] sm:$0xff]  ;;  %s523_s17 = scalar_lea.hbm %s568_s1, %s249_s25  ;;  %s525_s27 = int_to_ptr.vmem [resolvable:$true] %s164_s27 }
  0x39   : > { %143 = vst [vmem:[%s132_s26 + $0x10] sm:$0xff] %v135_v2  ;;  %v137_v4 = vld [vmem:[%s114_s24 + $0x20] sm:$0xff]  ;;  %v138_v5 = vld [vmem:[%s114_s24 + $0x28] sm:$0xff]  ;;  %144 = vst [vmem:[%s132_s26 + $0x18] sm:$0xff] %v136_v3  ;;  %s150_s10 = scalar_lea.sflag [#allocation4], %s511_s21  ;;  %s326_s30 = scalar_lea.vmem %s525_s27, 1024 }
  0x3a   : > { %145 = vst [vmem:[%s132_s26 + $0x20] sm:$0xff] %v137_v4  ;;  %146 = vst [vmem:[%s132_s26 + $0x28] sm:$0xff] %v138_v5  ;;  %v139_v6 = vld [vmem:[%s114_s24 + $0x30] sm:$0xff]  ;;  %v140_v7 = vld [vmem:[%s114_s24 + $0x38] sm:$0xff]  ;;  %p327_p6 = scmp.ne.s32.totalorder %s525_s27, %s326_s30  ;;  %p577_p11 = scmp.ne.s32.totalorder %s572_s18, 0 }
  0x3b   : > { %147 = vst [vmem:[%s132_s26 + $0x30] sm:$0xff] %v139_v6  ;;  %148 = vst [vmem:[%s132_s26 + $0x38] sm:$0xff] %v140_v7  ;;  %s395_s2 = smov [#allocation5]  }
  0x3c   : > { %p328_p12 = pnand %p327_p6, %p577_p11  ;;  %s330_s3 = sshll.u32 %s395_s2, 4  ;;  %s331_s3 = int_to_ptr.vmem [resolvable:$false] %s330_s3 }
  0x3d   : > { %s332_s4 = scalar_lea.vmem %s331_s3, 2048  ;;  %p333_p7 = scmp.lt.s32.totalorder %s525_s27, %s331_s3 }
  0x3e   : > { %p329_p13 = pneg %p328_p12  ;;  %p334_p10 = scmp.lt.s32.totalorder %s332_s4, %s326_s30 }
  0x40   : > { %p335_p2 = por %p334_p10, %p333_p7 }
  0x42   : > { %p336_p4 = pnand %p335_p2, %p329_p13 }
  0x44   : > { %339 = shalt.err (!%p336_p4)
}
  0x45   : > { %s340_s5 = scalar_lea.hbm %s523_s17, 1024  ;;  %s344_s14 = scalar_lea.hbm %s568_s1, 2048 }
  0x46   : > { %p341_p5 = scmp.ne.s32.totalorder %s523_s17, %s340_s5  ;;  %p345_p0 = scmp.lt.u32.totalorder %s523_s17, %s568_s1 }
  0x47   : > { %p346_p1 = scmp.lt.u32.totalorder %s344_s14, %s340_s5  ;;  %p348_p6 = scmp.lt.u32.totalorder %s340_s5, %s523_s17 }
  0x48   : > { %p342_p8 = pnand %p341_p5, %p577_p11 }
  0x49   : > { %p347_p3 = por %p346_p1, %p345_p0 }
  0x4a   : > { %p343_p9 = pneg %p342_p8 }
  0x4b   : > { %p349_p12 = por %p348_p6, %p347_p3 }
  0x4d   : > { %p350_p13 = pnand %p349_p12, %p343_p9 }
  0x4f   : > { %353 = shalt.err (!%p350_p13)
}
  0x50   : > { %252 = dma.vmem_to_hbm [thread:$0]  (%p577_p11), %s525_s27, 1024, %s523_s17, %s150_s10  }
  0x51 PF: > { %s176_s21 = sand.u32 1, %s380_s6   ;;  %p578_p7 = scmp.ne.s32.totalorder %s573_s19, 0 }
  0x52   : > { %p579_p10 = scmp.ge.s32.totalorder %s392_s9, 2  ;;  %s177_s22 = scalar_lea.sflag [#allocation4], %s176_s21 }
  0x54   : > { %p259_p2 = pnand %p579_p10, %p578_p7 }
  0x56   : > { %375 = dma.done.wait (!%p259_p2), %s177_s22, 1024  }
  0x57   : > { %377 = vsyncadd (!%p259_p2), %s177_s22, 4294966272  ;;  %p14_p4 = scmp.ge.s32.totalorder %s431_s12, 4   ;;  %s580_s6 = smov %s384_s7 }
  0x58   : > { %s581_s7 = smov %s388_s8  ;;  %s582_s8 = smov %s443_s15 }
  0x59   : > { %s583_s9 = smov %s431_s12  ;;  %16 = sbr.rel (!%p14_p4) target bundleno = 5 (0x5), region = 69 }
  0x60   :  { %182 = vsyncpa [#allocation3], 1 }
  0x61   :  { %184 = vsyncpa [#allocation3 + $0x1], 1 }
  0x62   :  { %185 = vsyncpa [#allocation4], 1 }
  0x63   :  { %187 = vsyncpa [#allocation4 + $0x1], 1 }

</bundles_post_ra>
